<compile_context>
chip_gen: v7x
topology: tpu7x:2x2x1
jax: 0.10.0
libtpu: 0.0.40
codegen_flags: <defaults>
</compile_context>

<pallas_src>
import math

import jax
import jax.numpy as jnp
from jax.experimental import pallas as pl
from jax.experimental.pallas import tpu as pltpu

_LANE = 128
_SUBLANE = 8
_MAX_REPACK_WIDTH = 2048                 # lane-width cap for the 2D lane-dense repack
_TILE_BYTES_TARGET = 4 * 1024 * 1024     # ~4 MiB blocks
_VMEM_LIMIT = 48 * 1024 * 1024           # in+out double-buffered at 4 MiB ~= 16 MiB << 48 MiB


def _round_tile(dim, target, mult):
    """Largest tile <= min(dim, target) that is a multiple of `mult`;
    if dim <= mult, use the full dim (legal: block equals array dim)."""
    if dim <= mult:
        return dim
    return max(mult, (min(dim, target) // mult) * mult)


def _lane_dense_width(total, period):
    """Width W that is a multiple of both 128 and `period` and divides `total`,
    grown toward _MAX_REPACK_WIDTH. None if no such W exists."""
    if total == 0:
        return None
    base = (period * _LANE) // math.gcd(period, _LANE)   # lcm(period, 128)
    if total % base != 0:
        return None
    w = base
    while w * 2 <= min(total, _MAX_REPACK_WIDTH) and total % (w * 2) == 0:
        w *= 2
    return w


# ----------------------------------------------------------------------------
# Kernel
# ----------------------------------------------------------------------------
def _bias_add_kernel(x_ref, b_ref, o_ref):
    # (TR, TW) + (1, TW) or (TR, 1): broadcast add; one load + one store per elem.
    o_ref[...] = x_ref[...] + b_ref[...]


# ----------------------------------------------------------------------------
# Tiled launcher
# ----------------------------------------------------------------------------
def _tiled_bias_add(x2, b2):
    """x2: (R, W); b2: (1, W) row bias or (R, 1) column bias; returns x2 + b2."""
    R, W = x2.shape
    item = jnp.dtype(x2.dtype).itemsize
    row_bias = b2.shape[0] == 1

    # Lane tile: prefer a full row (contiguous HBM descriptors, bias block is
    # grid-invariant along lanes); only lane-tile when even an 8-row slab of
    # full rows exceeds the per-block byte budget.
    if _SUBLANE * W * item <= _TILE_BYTES_TARGET:
        TW = W
    else:
        TW = max(_LANE, (_TILE_BYTES_TARGET // (_SUBLANE * item)) // _LANE * _LANE)

    target_rows = max(_SUBLANE, _TILE_BYTES_TARGET // max(1, TW * item))
    TR = _round_tile(R, target_rows, _SUBLANE)

    gR = pl.cdiv(R, TR)
    gW = pl.cdiv(W, TW)
    b_block = (1, TW) if row_bias else (TR, 1)

    # Put an axis with >= 2 blocks first so megacore (v7x: 2 TCs) shards real work.
    if gR < 2 and gW >= 2:
        grid = (gW, gR)
        x_map = lambda j, i: (i, j)
        b_map = (lambda j, i: (0, j)) if row_bias else (lambda j, i: (i, 0))
    else:
        grid = (gR, gW)
        x_map = lambda i, j: (i, j)
        b_map = (lambda i, j: (0, j)) if row_bias else (lambda i, j: (i, 0))

    return pl.pallas_call(
        _bias_add_kernel,
        out_shape=jax.ShapeDtypeStruct((R, W), x2.dtype),
        grid=grid,
        in_specs=[
            pl.BlockSpec((TR, TW), x_map),
            pl.BlockSpec(b_block, b_map),
        ],
        out_specs=pl.BlockSpec((TR, TW), x_map),
        compiler_params=pltpu.CompilerParams(
            dimension_semantics=("parallel", "parallel"),
            vmem_limit_bytes=_VMEM_LIMIT,
        ),
    )(x2, b2)


# ----------------------------------------------------------------------------
# AddBias forward
# ----------------------------------------------------------------------------
def _add_bias_2d(x, bias_param):
    B, F = x.shape
    # NOTE: bias cast to x.dtype (assumes the parameter shares the activation
    # dtype, as in the reference module; PyTorch would otherwise type-promote).
    b = bias_param.reshape(-1).astype(x.dtype)

    if F % _LANE == 0:
        return _tiled_bias_add(x, b.reshape(1, F))

    total = B * F
    # Lane-dense repack: flatten (B, F) to (rows, W), W a multiple of both 128
    # and F, so the bias pattern tiles exactly and stores are unmasked vst.
    W = _lane_dense_width(total, F)
    if W is not None:
        rows = total // W
        out = _tiled_bias_add(x.reshape(rows, W), jnp.tile(b, W // F).reshape(1, W))
        return out.reshape(B, F)

    # No exact lane-dense width: for large inputs pad the flat stream up to the
    # next multiple of lcm(F, 128) so stores stay lane-dense; tiny/odd shapes
    # (e.g. the ACKTR action-dim case) just run full-F blocks (fixed cost dominates).
    base = (F * _LANE) // math.gcd(F, _LANE)
    pad = (-total) % base
    if pad * 8 <= total:                                  # <= ~12.5% extra elements
        padded = total + pad
        Wp = _lane_dense_width(padded, F)
        rows = padded // Wp
        xpad = jnp.pad(x.reshape(-1), (0, pad)).reshape(rows, Wp)
        out = _tiled_bias_add(xpad, jnp.tile(b, Wp // F).reshape(1, Wp))
        return out.reshape(-1)[:total].reshape(B, F)

    return _tiled_bias_add(x, b.reshape(1, F))


def _add_bias_4d(x, bias_param):
    N, C, H, W = x.shape
    HW = H * W
    NC = N * C
    b = bias_param.reshape(-1).astype(x.dtype)            # (C,)
    # Flatten to (N*C, H*W) with an (N*C, 1) bias column: many channels pack into
    # the sublane axis of each multi-MiB block instead of one (n, c) row per step,
    # and there is no untiled SMEM bias table to outgrow.
    bcol = jnp.tile(b, N).reshape(NC, 1)                   # row n*C + c -> bias[c]
    out2 = _tiled_bias_add(x.reshape(NC, HW), bcol)
    return out2.reshape(N, C, H, W)


def add_bias(x, bias_param):
    """Forward pass of AddBias. bias_param: (F, 1), mirroring bias.unsqueeze(1)."""
    if x.ndim == 2:
        return _add_bias_2d(x, bias_param)
    elif x.ndim == 4:
        return _add_bias_4d(x, bias_param)
    else:
        raise ValueError(f"AddBias expects 2D or 4D input, got ndim={x.ndim}")


if __name__ == "__main__":
    key = jax.random.PRNGKey(0)
    k1, k2, k3, k4, k5, k6 = jax.random.split(key, 6)

    # ---- 4D case: NCHW input, per-channel bias -----------------------------
    N, C, H, W = 2, 4, 16, 16
    x4 = jax.random.normal(k1, (N, C, H, W), dtype=jnp.float32)
    bias_c = jax.random.normal(k2, (C,), dtype=jnp.float32)
    bias_param_c = bias_c.reshape(C, 1)                           # bias.unsqueeze(1)

    out4 = jax.block_until_ready(add_bias(x4, bias_param_c))
    ref4 = x4 + bias_c.reshape(1, C, 1, 1)
    assert out4.shape == x4.shape and out4.dtype == x4.dtype
    assert jnp.allclose(out4, ref4, atol=1e-6, rtol=1e-6)

    # ---- 2D case: (batch, features) input ----------------------------------
    B, F = 2, 32
    x2 = jax.random.normal(k3, (B, F), dtype=jnp.float32)
    bias_f = jax.random.normal(k4, (F,), dtype=jnp.float32)
    bias_param_f = bias_f.reshape(F, 1)                           # bias.unsqueeze(1)

    out2 = jax.block_until_ready(add_bias(x2, bias_param_f))
    ref2 = x2 + bias_f.reshape(1, F)
    assert out2.shape == x2.shape and out2.dtype == x2.dtype
    assert jnp.allclose(out2, ref2, atol=1e-6, rtol=1e-6)

    # ---- larger 2D: exact lane-dense repack path ----------------------------
    xb2 = jax.random.normal(k3, (256, 32), dtype=jnp.float32)
    outb2 = jax.block_until_ready(add_bias(xb2, bias_param_f))
    assert jnp.allclose(outb2, xb2 + bias_f.reshape(1, F), atol=1e-6, rtol=1e-6)

    # ---- 2D with odd F / padded lane-dense fallback path --------------------
    Fo = 24
    bias_o = jax.random.normal(k5, (Fo,), dtype=jnp.float32)
    xo2 = jax.random.normal(k6, (100, Fo), dtype=jnp.float32)
    outo2 = jax.block_until_ready(add_bias(xo2, bias_o.reshape(Fo, 1)))
    assert jnp.allclose(outo2, xo2 + bias_o.reshape(1, Fo), atol=1e-6, rtol=1e-6)

    # ---- larger 4D (multi-channel sublane packing) + odd spatial 4D ---------
    xb4 = jax.random.normal(k1, (2, 4, 64, 64), dtype=jnp.float32)
    outb4 = jax.block_until_ready(add_bias(xb4, bias_param_c))
    assert jnp.allclose(outb4, xb4 + bias_c.reshape(1, C, 1, 1), atol=1e-6, rtol=1e-6)

    bias_3 = jax.random.normal(k2, (3,), dtype=jnp.float32)
    xo4 = jax.random.normal(k4, (2, 3, 10, 10), dtype=jnp.float32)
    outo4 = jax.block_until_ready(add_bias(xo4, bias_3.reshape(3, 1)))
    assert jnp.allclose(outo4, xo4 + bias_3.reshape(1, 3, 1, 1), atol=1e-6, rtol=1e-6)

    print("KERNEL_OK")
</pallas_src>

<mosaic_0001>
module attributes {stable_mosaic.version = 11 : i64} {
  func.func @_bias_add_kernel(%arg0: i32, %arg1: i32, %arg2: memref<8x256xf32, #tpu.memory_space<vmem>>, %arg3: memref<8x1xf32, #tpu.memory_space<vmem>>, %arg4: memref<8x256xf32, #tpu.memory_space<vmem>>) attributes {dimension_semantics = [#tpu.dimension_semantics<parallel>, #tpu.dimension_semantics<parallel>], iteration_bounds = array<i64: 1, 1>, scalar_prefetch = 0 : i64, scratch_operands = 0 : i64, tpu.core_type = #tpu.core_type<tc>, window_params = [{transform_indices = @transform_0, window_bounds = array<i64: 8, 256>}, {transform_indices = @transform_1, window_bounds = array<i64: 8, 1>}, {transform_indices = @transform_2, window_bounds = array<i64: 8, 256>}]} {
    %c0 = arith.constant 0 : index
    %c0_0 = arith.constant 0 : index
    %0 = vector.load %arg2[%c0, %c0_0] : memref<8x256xf32, #tpu.memory_space<vmem>>, vector<8x256xf32>
    %c0_1 = arith.constant 0 : index
    %c0_2 = arith.constant 0 : index
    %1 = vector.load %arg3[%c0_1, %c0_2] : memref<8x1xf32, #tpu.memory_space<vmem>>, vector<8x1xf32>
    %2 = vector.broadcast %1 : vector<8x1xf32> to vector<8x256xf32>
    %3 = arith.addf %0, %2 : vector<8x256xf32>
    %c0_3 = arith.constant 0 : index
    %c0_4 = arith.constant 0 : index
    %4 = vector.load %arg4[%c0_3, %c0_4] : memref<8x256xf32, #tpu.memory_space<vmem>>, vector<8x256xf32>
    tpu.vector_store %arg4[%c0_3, %c0_4], %3 {strides = array<i32>} : memref<8x256xf32, #tpu.memory_space<vmem>>, vector<8x256xf32>,
    return
  }
  func.func @transform_0(%arg0: i32, %arg1: i32) -> (i32, i32) {
    %c0_i32 = arith.constant 0 : i32
    return %arg0, %arg1 : i32, i32
  }
  func.func @transform_1(%arg0: i32, %arg1: i32) -> (i32, i32) {
    %c0_i32 = arith.constant 0 : i32
    %c0_i32_0 = arith.constant 0 : i32
    return %arg0, %c0_i32 : i32, i32
  }
  func.func @transform_2(%arg0: i32, %arg1: i32) -> (i32, i32) {
    %c0_i32 = arith.constant 0 : i32
    return %arg0, %arg1 : i32, i32
  }
}

</mosaic_0001>

<bundles_post_ra>
// kernel: tpu_custom_call.1
= control target key start
LH: loop header
LB: loop body
LE: loop exit
PB: predicated region body
PF: predicated region fallthrough
CT: control target
= control target key end

     0   :  { %7 = vsyncpa [#allocation3], 0  ;;  %s148_s0 = inlined_call_operand.hbm [shape: f32[8,256], index: 0, kind: input, shape index: {}]   ;;  %s149_s1 = inlined_call_operand.vmem [shape: f32[8,1], index: 1, kind: input, shape index: {}]   ;;  %s150_s2 = inlined_call_operand.hbm [shape: f32[8,256], index: 2, kind: output, shape index: {}]  }
   0x1   :  { %8 = vsyncpa [#allocation4], 0  ;;  %s103_s9 = smov [#allocation2]   ;;  %s55_s13 = scalar_lea.hbm %s148_s0, 256 }
   0x2   :  { %s15_s10 = sshll.u32 %s103_s9, 4  ;;  %p56_p0 = scmp.ne.s32.totalorder %s148_s0, %s55_s13  ;;  %s16_s10 = int_to_ptr.vmem [resolvable:$true] %s15_s10 }
   0x3   :  { %p59_p1 = scmp.lt.u32.totalorder %s55_s13, %s148_s0 }
   0x5   :  { %p61_p2 = pnand %p59_p1, %p56_p0 }
   0x7   :  { %64 = shalt.err (!%p61_p2)
}
   0x8   :  { %s65_s18 = scalar_lea.vmem %s16_s10, 256  ;;  %p70_p4 = scmp.lt.s32.totalorder %s16_s10, %s16_s10 }
   0x9   :  { %p66_p3 = scmp.ne.s32.totalorder %s16_s10, %s65_s18  ;;  %p71_p5 = scmp.lt.s32.totalorder %s65_s18, %s65_s18 }
   0xb   :  { %p72_p6 = por %p71_p5, %p70_p4 }
   0xd   :  { %p73_p7 = pnand %p72_p6, %p66_p3 }
   0xf   :  { %76 = shalt.err (!%p73_p7)
}
  0x10   :  { %18 = dma.hbm_to_vmem [thread:$0]  %s148_s0, 256, %s16_s10, [#allocation3]  }
  0x11   :  { %99 = dma.done.wait [#allocation3], 256  }
  0x12   :  { %100 = vsyncadd [#allocation3], 4294967040  ;;  %v104_v0 = vmov 0   ;;  %v26_v1 = vld [vmem:[%s149_s1] sm:$0xff]  ;;  %v25_v3 = vld [vmem:[#allocation2 + $0x8] sm:$0xff]  ;;  %s105_s23 = smov [#allocation5]  }
  0x13   :  { %54 = vset.pattern.permute.xlu0 %v104_v0  ;;  %v24_v2 = vld [vmem:[#allocation2] sm:$0xff]  ;;  %s42_s24 = sshll.u32 %s105_s23, 4  ;;  %s43_s24 = int_to_ptr.vmem [resolvable:$true] %s42_s24 }
  0x14   :  { %29 = vperm.xlu0 %54, %v26_v1   ;;  %s77_s0 = scalar_lea.vmem %s43_s24, 256  ;;  %p82_p9 = scmp.lt.s32.totalorder %s43_s24, %s43_s24 }
  0x15   :  { %p78_p8 = scmp.ne.s32.totalorder %s43_s24, %s77_s0  ;;  %p83_p10 = scmp.lt.s32.totalorder %s77_s0, %s77_s0 }
  0x17   :  { %p84_p11 = por %p83_p10, %p82_p9 }
  0x19   :  { %p85_p12 = pnand %p84_p11, %p78_p8 }
  0x93   :  { %v30_v4 = vpop.permute.xlu0 %29 }
  0x94   :  { %v32_v5 = vadd.f32 %v30_v4, %v24_v2  ;;  %v33_v6 = vadd.f32 %v30_v4, %v25_v3 }
  0x96   :  { %34 = vst [vmem:[#allocation5] sm:$0xff] %v32_v5  ;;  %35 = vst [vmem:[#allocation5 + $0x8] sm:$0xff] %v33_v6 }
  0x97   :  { %88 = shalt.err (!%p85_p12)
}
  0x98   :  { %s89_s26 = scalar_lea.hbm %s150_s2, 256 }
  0x99   :  { %p90_p13 = scmp.ne.s32.totalorder %s150_s2, %s89_s26  ;;  %p93_p0 = scmp.lt.u32.totalorder %s89_s26, %s150_s2 }
  0x9b   :  { %p95_p1 = pnand %p93_p0, %p90_p13 }
  0x9d   :  { %98 = shalt.err (!%p95_p1)
}
  0x9e   :  { %45 = dma.vmem_to_hbm [thread:$0]  %s43_s24, 256, %s150_s2, [#allocation4]  }
  0x9f   :  { %101 = dma.done.wait [#allocation4], 256  }
  0xa0   :  { %102 = vsyncadd [#allocation4], 4294967040 }
  0xa1   :  { %49 = vsyncpa [#allocation3], 1 }
  0xa2   :  { %50 = vsyncpa [#allocation4], 1 }

</bundles_post_ra>
